<compile_context>
chip_gen: v7x
topology: tpu7x:2x2x1
jax: 0.10.0
libtpu: 0.0.40
codegen_flags: <defaults>
</compile_context>

<pallas_src>
import functools
from typing import NamedTuple

import jax
import jax.numpy as jnp
from jax.experimental import pallas as pl
from jax.experimental.pallas import tpu as pltpu

_LANE = 128
_SUBLANE = 8
_NEG_BIG = -1e30  # finite "-inf": exp underflows to exactly 0 for padded classes


def _round_up(x, m):
    return ((x + m - 1) // m) * m


def _vmem_budget_bytes():
    """Generation-aware VMEM budget with headroom for compiler scratch."""
    try:
        cap = int(pltpu.get_tpu_info().vmem_capacity_bytes)
    except Exception:
        cap = 64 * 1024 * 1024  # conservative fallback: assume v7x (64 MiB/TC)
    # ~75% of physical, capped at 100 MiB (v5e/v6e -> ~96 MiB, v7x -> 48 MiB).
    return int(min(cap * 3 // 4, 100 * 1024 * 1024))


# --------------------------------------------------------------------------- #
# Kernels
# --------------------------------------------------------------------------- #
def _fused_kernel(x_ref, w_ref, b_ref, o_ref):
    """Single-step path: softmax(x_tile @ W + b) fused in one grid step.

    x_ref: (TM, Dp)  activation row tile (full reduction width)
    w_ref: (Dp, Kp)  full weight matrix (VMEM-resident, DMA'd once)
    b_ref: (1,  Kp)  bias (f32, padded classes = -1e30)
    o_ref: (TM, Kp)  output probabilities
    """
    logits = jnp.dot(x_ref[...], w_ref[...], preferred_element_type=jnp.float32)
    logits = logits + b_ref[...]
    m = jnp.max(logits, axis=-1, keepdims=True)
    e = jnp.exp(logits - m)
    denom = jnp.sum(e, axis=-1, keepdims=True)
    # Exact division: epilogue runs once per row tile, so the precise
    # reciprocal is essentially free and keeps rows summing to 1.
    o_ref[...] = (e / denom).astype(o_ref.dtype)


def _tiled_kernel(x_ref, w_ref, b_ref, o_ref, acc_ref):
    """D-tiled path: accumulate partial matmuls, softmax on the last k step.

    x_ref:   (TM, TK)  activation tile
    w_ref:   (TK, Kp)  weight tile (streamed along the reduction axis)
    b_ref:   (1,  Kp)  bias (VMEM resident across the whole grid)
    o_ref:   (TM, Kp)  output probabilities (resident across the k axis)
    acc_ref: (TM, Kp)  f32 accumulator scratch (persists across k steps)
    """
    k = pl.program_id(1)
    part = jnp.dot(x_ref[...], w_ref[...], preferred_element_type=jnp.float32)

    @pl.when(k == 0)
    def _first():
        acc_ref[...] = part  # direct first-store: no separate zero-init pass

    @pl.when(k > 0)
    def _accum():
        acc_ref[...] += part

    @pl.when(k == pl.num_programs(1) - 1)
    def _epilogue():
        logits = acc_ref[...] + b_ref[...]
        m = jnp.max(logits, axis=-1, keepdims=True)
        e = jnp.exp(logits - m)
        denom = jnp.sum(e, axis=-1, keepdims=True)
        o_ref[...] = (e / denom).astype(o_ref.dtype)


# --------------------------------------------------------------------------- #
# Parameter packing (do this ONCE at layer init, not per forward call)
# --------------------------------------------------------------------------- #
class PackedAffine(NamedTuple):
    w: jax.Array  # (Dp, Kp) compute dtype (default bf16), zero-padded
    b: jax.Array  # (1, Kp)  float32, padded class columns hold -1e30


def pack_affine_params(w, b, *, compute_dtype=jnp.bfloat16):
    """Pad K -> multiple of 128 (lane-dense output), D -> multiple of 128,
    and cast the weight stream to the compute dtype. Amortized to init time."""
    D, K = int(w.shape[0]), int(w.shape[1])
    Dp = _round_up(D, _LANE)
    Kp = _round_up(K, _LANE)
    w_p = jnp.pad(w.astype(jnp.float32), ((0, Dp - D), (0, Kp - K)))
    w_p = w_p.astype(compute_dtype)
    b_p = jnp.pad(b.astype(jnp.float32), (0, Kp - K),
                  constant_values=_NEG_BIG).reshape(1, Kp)
    return PackedAffine(w=w_p, b=b_p)


# --------------------------------------------------------------------------- #
# Forward wrapper
# --------------------------------------------------------------------------- #
def affine_and_softmax(inp_nchw, w_packed, b_packed, num_classes,
                       *, compute_dtype=None, row_tile=None, k_tile=None):
    """softmax(inp.reshape(N, -1) @ w + b) per sample. Returns (N, K)."""
    N = int(inp_nchw.shape[0])
    D = 1
    for s in inp_nchw.shape[1:]:
        D *= int(s)
    Dp, Kp = int(w_packed.shape[0]), int(w_packed.shape[1])
    K = int(num_classes)
    assert Dp >= D and Dp % _LANE == 0 and Kp % _LANE == 0 and K <= Kp

    if compute_dtype is None:
        compute_dtype = w_packed.dtype
    out_dtype = inp_nchw.dtype
    xb = jnp.dtype(compute_dtype).itemsize
    wb = jnp.dtype(w_packed.dtype).itemsize
    ob = jnp.dtype(out_dtype).itemsize

    budget = _vmem_budget_bytes()

    # ---- row tile -----------------------------------------------------------
    if row_tile is None:
        row_tile = 512  # fills the MXU M dimension for large N (mult of 256)
    tm = _round_up(min(max(N, 1), int(row_tile)), _SUBLANE)
    if N >= 2 * _SUBLANE:
        # Keep grid[0] >= 2 when the batch allows it, so both of v7x's
        # TensorCores get a row tile ("parallel" axis shards across cores).
        tm = min(tm, _round_up(pl.cdiv(N, 2), _SUBLANE))
    # Shrink tm if the K-resident pieces alone would blow the budget (huge Kp).
    while tm > _SUBLANE and (3 * tm * Kp * 4) > budget // 2:
        tm = max(_SUBLANE, _round_up(tm // 2, _SUBLANE))
    Np = _round_up(N, tm)
    n_row_tiles = Np // tm

    # ---- host-side activation packing (layout plumbing only) ----------------
    x2d = inp_nchw.reshape(N, D).astype(compute_dtype)  # row-major NCHW flatten
    x_p = jnp.pad(x2d, ((0, Np - N), (0, Dp - D)))

    # ---- fast path: one grid step over D, weights VMEM-resident --------------
    fast_bytes = (2 * tm * Dp * xb + 2 * Dp * Kp * wb + 2 * tm * Kp * ob
                  + 2 * _SUBLANE * Kp * 4)
    use_fast = (k_tile is None) and (fast_bytes <= budget)

    if use_fast:
        vmem_limit = int(min(budget, max(fast_bytes + (4 << 20), 16 << 20)))
        cost = pl.CostEstimate(
            flops=2 * Np * Dp * Kp,
            transcendentals=Np * Kp,
            bytes_accessed=Np * Dp * xb + Dp * Kp * wb + Np * Kp * ob,
        )
        out_p = pl.pallas_call(
            _fused_kernel,
            out_shape=jax.ShapeDtypeStruct((Np, Kp), out_dtype),
            grid=(n_row_tiles,),
            in_specs=[
                pl.BlockSpec((tm, Dp), lambda i: (i, 0)),   # x: row tiled, full D
                pl.BlockSpec((Dp, Kp), lambda i: (0, 0)),   # w: resident, DMA'd once
                pl.BlockSpec((1, Kp), lambda i: (0, 0)),    # b: resident
            ],
            out_specs=pl.BlockSpec((tm, Kp), lambda i: (i, 0)),
            compiler_params=pltpu.CompilerParams(
                dimension_semantics=("parallel",),
                vmem_limit_bytes=vmem_limit,
            ),
            cost_estimate=cost,
        )(x_p, w_packed, b_packed)
        return out_p[:N, :K]

    # ---- tiled path: stream w along D with an f32 accumulator ----------------
    if k_tile is None:
        fixed = 2 * tm * Kp * ob + tm * Kp * 4 + 2 * _SUBLANE * Kp * 4
        tk_max = (budget - fixed) // (2 * xb * tm + 2 * wb * Kp)
        tk_max = max(_LANE, min(int(tk_max), Dp))
    else:
        tk_max = max(_LANE, min(_round_up(int(k_tile), _LANE), Dp))
    # Largest multiple-of-128 divisor of Dp that fits the budget: the
    # activation then needs no extra per-call padding along D.
    tk = _LANE
    cand = (tk_max // _LANE) * _LANE
    while cand >= _LANE:
        if Dp % cand == 0:
            tk = cand
            break
        cand -= _LANE
    n_k_tiles = Dp // tk

    tiled_bytes = (2 * tm * tk * xb + 2 * tk * Kp * wb + 2 * tm * Kp * ob
                   + tm * Kp * 4 + 2 * _SUBLANE * Kp * 4)
    vmem_limit = int(min(budget, max(tiled_bytes + (4 << 20), 16 << 20)))

    cost = pl.CostEstimate(
        flops=2 * Np * Dp * Kp,
        transcendentals=Np * Kp,
        # w is re-streamed once per row tile when n_row_tiles > 1.
        bytes_accessed=Np * Dp * xb + n_row_tiles * Dp * Kp * wb + Np * Kp * ob,
    )

    out_p = pl.pallas_call(
        _tiled_kernel,
        out_shape=jax.ShapeDtypeStruct((Np, Kp), out_dtype),
        grid=(n_row_tiles, n_k_tiles),
        in_specs=[
            pl.BlockSpec((tm, tk), lambda i, kk: (i, kk)),  # x: row & k tiled
            pl.BlockSpec((tk, Kp), lambda i, kk: (kk, 0)),  # w: streamed over k
            pl.BlockSpec((1, Kp), lambda i, kk: (0, 0)),    # b: VMEM resident
        ],
        out_specs=pl.BlockSpec((tm, Kp), lambda i, kk: (i, 0)),
        scratch_shapes=[pltpu.VMEM((tm, Kp), jnp.float32)],
        compiler_params=pltpu.CompilerParams(
            dimension_semantics=("parallel", "arbitrary"),
            vmem_limit_bytes=vmem_limit,
        ),
        cost_estimate=cost,
    )(x_p, w_packed, b_packed)
    return out_p[:N, :K]


# --------------------------------------------------------------------------- #
# Self-test
# --------------------------------------------------------------------------- #
if __name__ == "__main__":
    # Small shapes consistent with the module: affine_weight_shape = (C, H, W, K)
    N, C, H, W, K = 2, 4, 16, 16, 10
    D = C * H * W
    std = 1.0 / K  # "Lecun initialization SD" from the module's __init__

    key = jax.random.PRNGKey(0)
    kx, kw, kb = jax.random.split(key, 3)

    x = jax.random.normal(kx, (N, C, H, W), dtype=jnp.float32)
    w = std * jax.random.normal(kw, (D, K), dtype=jnp.float32)
    b = std * jax.random.normal(kb, (K,), dtype=jnp.float32)

    # Weights are padded / cast to bf16 ONCE (init time), not per forward call.
    packed = pack_affine_params(w, b, compute_dtype=jnp.bfloat16)

    fwd = jax.jit(functools.partial(affine_and_softmax, num_classes=K))
    out = jax.block_until_ready(fwd(x, packed.w, packed.b))
    assert out.shape == (N, K)

    # Reference with the same bf16 input rounding (kernel accumulates in f32).
    x2d = x.reshape(N, D)
    xw_bf = jnp.dot(
        x2d.astype(jnp.bfloat16).astype(jnp.float32),
        w.astype(jnp.bfloat16).astype(jnp.float32),
        precision=jax.lax.Precision.HIGHEST,
    )
    ref_bf = jax.nn.softmax(xw_bf + b, axis=-1)
    assert jnp.allclose(out, ref_bf, atol=5e-3, rtol=5e-3), "mismatch vs bf16 ref"

    # Loose sanity check against the pure-f32 reference (bf16 input rounding).
    ref_f32 = jax.nn.softmax(x2d @ w + b, axis=-1)
    assert jnp.allclose(out, ref_f32, atol=2e-2, rtol=2e-2), "mismatch vs f32 ref"

    # Exact-division epilogue: probability rows sum to 1.
    assert jnp.allclose(jnp.sum(out, axis=-1), 1.0, atol=1e-3)

    print("KERNEL_OK")
</pallas_src>

<mosaic_0001>
module attributes {stable_mosaic.version = 11 : i64} {
  func.func @_fused_kernel(%arg0: i32, %arg1: memref<8x1024xbf16, #tpu.memory_space<vmem>>, %arg2: memref<1024x128xbf16, #tpu.memory_space<vmem>>, %arg3: memref<1x128xf32, #tpu.memory_space<vmem>>, %arg4: memref<8x128xf32, #tpu.memory_space<vmem>>) attributes {dimension_semantics = [#tpu.dimension_semantics<parallel>], iteration_bounds = array<i64: 1>, scalar_prefetch = 0 : i64, scratch_operands = 0 : i64, tpu.core_type = #tpu.core_type<tc>, window_params = [{transform_indices = @transform_0, window_bounds = array<i64: 8, 1024>}, {pipeline_mode = #tpu.pipeline_mode<synchronous>, transform_indices = @transform_1, window_bounds = array<i64: 1024, 128>}, {pipeline_mode = #tpu.pipeline_mode<synchronous>, transform_indices = @transform_2, window_bounds = array<i64: 1, 128>}, {transform_indices = @transform_3, window_bounds = array<i64: 8, 128>}]} {
    %c0 = arith.constant 0 : index
    %c0_0 = arith.constant 0 : index
    %0 = vector.load %arg1[%c0, %c0_0] : memref<8x1024xbf16, #tpu.memory_space<vmem>>, vector<8x1024xbf16>
    %c0_1 = arith.constant 0 : index
    %c0_2 = arith.constant 0 : index
    %1 = vector.load %arg2[%c0_1, %c0_2] : memref<1024x128xbf16, #tpu.memory_space<vmem>>, vector<1024x128xbf16>
    %cst = arith.constant dense<0.000000e+00> : vector<8x128xf32>
    %2 = tpu.matmul %0, %1, %cst {dimension_numbers = #tpu.dot_dimension_numbers<[1], [0], [0], [1], [0, 0, 1, 1], [], []>} : vector<8x1024xbf16>, vector<1024x128xbf16>, vector<8x128xf32> -> vector<8x128xf32>
    %c0_3 = arith.constant 0 : index
    %c0_4 = arith.constant 0 : index
    %3 = vector.load %arg3[%c0_3, %c0_4] : memref<1x128xf32, #tpu.memory_space<vmem>>, vector<1x128xf32>
    %4 = vector.broadcast %3 : vector<1x128xf32> to vector<8x128xf32>
    %5 = arith.addf %2, %4 : vector<8x128xf32>
    %cst_5 = arith.constant dense<0xFF800000> : vector<8xf32>
    %6 = vector.multi_reduction <maximumf>, %5, %cst_5 [1] : vector<8x128xf32> to vector<8xf32>
    %7 = vector.shape_cast %6 : vector<8xf32> to vector<8x1xf32>
    %8 = vector.broadcast %7 : vector<8x1xf32> to vector<8x128xf32>
    %9 = arith.subf %5, %8 : vector<8x128xf32>
    %10 = math.exp %9 : vector<8x128xf32>
    %cst_6 = arith.constant dense<0.000000e+00> : vector<8xf32>
    %11 = vector.multi_reduction <add>, %10, %cst_6 [1] : vector<8x128xf32> to vector<8xf32>
    %12 = vector.shape_cast %11 : vector<8xf32> to vector<8x1xf32>
    %13 = vector.broadcast %12 : vector<8x1xf32> to vector<8x128xf32>
    %14 = arith.divf %10, %13 : vector<8x128xf32>
    %c0_7 = arith.constant 0 : index
    %c0_8 = arith.constant 0 : index
    %15 = vector.load %arg4[%c0_7, %c0_8] : memref<8x128xf32, #tpu.memory_space<vmem>>, vector<8x128xf32>
    tpu.vector_store %arg4[%c0_7, %c0_8], %14 {strides = array<i32>} : memref<8x128xf32, #tpu.memory_space<vmem>>, vector<8x128xf32>,
    return
  }
  func.func @transform_0(%arg0: i32) -> (i32, i32) {
    %c0_i32 = arith.constant 0 : i32
    %c0_i32_0 = arith.constant 0 : i32
    return %arg0, %c0_i32 : i32, i32
  }
  func.func @transform_1(%arg0: i32) -> (i32, i32) {
    %c0_i32 = arith.constant 0 : i32
    %c0_i32_0 = arith.constant 0 : i32
    %c0_i32_1 = arith.constant 0 : i32
    return %c0_i32, %c0_i32_0 : i32, i32
  }
  func.func @transform_2(%arg0: i32) -> (i32, i32) {
    %c0_i32 = arith.constant 0 : i32
    %c0_i32_0 = arith.constant 0 : i32
    %c0_i32_1 = arith.constant 0 : i32
    return %c0_i32, %c0_i32_0 : i32, i32
  }
  func.func @transform_3(%arg0: i32) -> (i32, i32) {
    %c0_i32 = arith.constant 0 : i32
    %c0_i32_0 = arith.constant 0 : i32
    return %arg0, %c0_i32 : i32, i32
  }
}

</mosaic_0001>

<bundles_post_ra>
// kernel: affine_and_softmax.1
= control target key start
LH: loop header
LB: loop body
LE: loop exit
PB: predicated region body
PF: predicated region fallthrough
CT: control target
= control target key end

     0   :  { %8 = vsyncpa [#allocation3], 0  ;;  %s1019_s12 = smov [#allocation2]   ;;  %s1072_s0 = inlined_call_operand.vmem [shape: bf16[8,1024], index: 0, kind: input, shape index: {}]   ;;  %s1073_s1 = inlined_call_operand.hbm [shape: bf16[1024,128], index: 1, kind: input, shape index: {}]   ;;  %s1074_s2 = inlined_call_operand.vmem [shape: f32[1,128], index: 2, kind: input, shape index: {}]   ;;  %s1075_s3 = inlined_call_operand.vmem [shape: f32[8,128], index: 3, kind: output, shape index: {}]  }
   0x1   :  { %s16_s13 = sshll.u32 %s1019_s12, 4  ;;  %s995_s16 = scalar_lea.hbm %s1073_s1, 8192  ;;  %s17_s13 = int_to_ptr.vmem [resolvable:$true] %s16_s13 }
   0x2   :  { %p996_p0 = scmp.ne.s32.totalorder %s1073_s1, %s995_s16  ;;  %p999_p1 = scmp.lt.u32.totalorder %s995_s16, %s1073_s1 }
   0x4   :  { %p1001_p2 = pnand %p999_p1, %p996_p0 }
   0x6   :  { %1004 = shalt.err (!%p1001_p2)
}
   0x7   :  { %s1005_s21 = scalar_lea.vmem %s17_s13, 8192  ;;  %p1010_p4 = scmp.lt.s32.totalorder %s17_s13, %s17_s13 }
   0x8   :  { %p1006_p3 = scmp.ne.s32.totalorder %s17_s13, %s1005_s21  ;;  %p1011_p5 = scmp.lt.s32.totalorder %s1005_s21, %s1005_s21 }
   0xa   :  { %p1012_p6 = por %p1011_p5, %p1010_p4 }
   0xc   :  { %p1013_p7 = pnand %p1012_p6, %p1006_p3 }
   0xe   :  { %1016 = shalt.err (!%p1013_p7)
}
   0xf   :  { %s1020_s22 = smov 64   ;;  %s1021_s23 = smov 4  }
  0x10   :  { %22 = dma.hbm_to_vmem [thread:$0]  %s1073_s1, 8192, %s17_s13, [#allocation3], %s1020_s22, %s1020_s22, %s1021_s23  }
  0x11   :  { %1017 = dma.done.wait [#allocation3], 8192  }
  0x12   :  { %1018 = vsyncadd [#allocation3], 4294959104  ;;  %v919_v0 = vld [vmem:[#allocation2 + $0x40] sm:$0xff]   ;;  %v923_v4 = vld [vmem:[#allocation2 + $0x48] sm:$0xff]  }
  0x13   :  { %v920_v1 = vld [vmem:[#allocation2 + $0xc0] sm:$0xff]   ;;  %828 = vmatprep.subr.bf16.mxu0 %v919_v0  ;;  %v924_v5 = vld [vmem:[#allocation2 + $0xc8] sm:$0xff]   ;;  %v927_v8 = vld [vmem:[#allocation2 + $0x50] sm:$0xff]  }
  0x14   :  { %v921_v2 = vld [vmem:[#allocation2] sm:$0xff]   ;;  %850 = vmatprep.subr.bf16.mxu1 %v920_v1  ;;  %v925_v6 = vld [vmem:[#allocation2 + $0x8] sm:$0xff]   ;;  %v928_v9 = vld [vmem:[#allocation2 + $0xd0] sm:$0xff]  }
  0x15   :  { %v922_v3 = vld [vmem:[#allocation2 + $0x80] sm:$0xff]   ;;  %829 = vmatpush3.bf16.msra.mxu0 %v921_v2  ;;  %v926_v7 = vld [vmem:[#allocation2 + $0x88] sm:$0xff]   ;;  %v929_v10 = vld [vmem:[#allocation2 + $0x10] sm:$0xff]  }
  0x16   :  { %851 = vmatpush3.bf16.msra.mxu1 %v922_v3  ;;  %830 = vmatprep.subr.bf16.mxu0 %v923_v4  ;;  %v930_v11 = vld [vmem:[#allocation2 + $0x90] sm:$0xff]   ;;  %v931_v12 = vld [vmem:[#allocation2 + $0x58] sm:$0xff]   ;;  %v935_v16 = vld [vmem:[#allocation2 + $0x60] sm:$0xff]  }
  0x17   :  { %852 = vmatprep.subr.bf16.mxu1 %v924_v5  ;;  %v932_v13 = vld [vmem:[#allocation2 + $0xd8] sm:$0xff]   ;;  %v936_v17 = vld [vmem:[#allocation2 + $0xe0] sm:$0xff]   ;;  %v939_v20 = vld [vmem:[#allocation2 + $0x68] sm:$0xff]  }
  0x18   :  { %v933_v14 = vld [vmem:[#allocation2 + $0x18] sm:$0xff]   ;;  %v937_v18 = vld [vmem:[#allocation2 + $0x20] sm:$0xff]   ;;  %v940_v21 = vld [vmem:[#allocation2 + $0xe8] sm:$0xff]  }
  0x19   :  { %831 = vmatpush3.bf16.msra.mxu0 %v925_v6  ;;  %v934_v15 = vld [vmem:[#allocation2 + $0x98] sm:$0xff]   ;;  %v938_v19 = vld [vmem:[#allocation2 + $0xa0] sm:$0xff]   ;;  %v941_v22 = vld [vmem:[#allocation2 + $0x28] sm:$0xff]  }
  0x1a   :  { %853 = vmatpush3.bf16.msra.mxu1 %v926_v7  ;;  %832 = vmatprep.subr.bf16.mxu0 %v927_v8  ;;  %v942_v23 = vld [vmem:[#allocation2 + $0xa8] sm:$0xff]   ;;  %v943_v24 = vld [vmem:[#allocation2 + $0x70] sm:$0xff]   ;;  %v947_v28 = vld [vmem:[#allocation2 + $0x78] sm:$0xff]  }
  0x1b   :  { %854 = vmatprep.subr.bf16.mxu1 %v928_v9  ;;  %v944_v25 = vld [vmem:[#allocation2 + $0xf0] sm:$0xff]   ;;  %v948_v29 = vld [vmem:[#allocation2 + $0xf8] sm:$0xff]   ;;  %v29_v32 = vld [vmem:[%s1072_s0] sm:$0xff] }
  0x1c   :  { %v945_v26 = vld [vmem:[#allocation2 + $0x30] sm:$0xff]   ;;  %v949_v30 = vld [vmem:[#allocation2 + $0x38] sm:$0xff]   ;;  %v30_v33 = vld [vmem:[%s1072_s0 + $0x8] sm:$0xff]  ;;  %v756_v34 = vcombine.low %v29_v32, %v29_v32  ;;  %v757_v35 = vcombine.high %v29_v32, %v29_v32 }
  0x1d   :  { %833 = vmatpush3.bf16.msra.mxu0 %v929_v10  ;;  %v946_v27 = vld [vmem:[#allocation2 + $0xb0] sm:$0xff]   ;;  %v950_v31 = vld [vmem:[#allocation2 + $0xb8] sm:$0xff]   ;;  %v758_v36 = vcombine.low %v30_v33, %v30_v33  ;;  %v759_v37 = vcombine.high %v30_v33, %v30_v33  ;;  %v955_v38 = vld [vmem:[#allocation2 + $0x140] sm:$0xff]  }
  0x1e   :  { %855 = vmatpush3.bf16.msra.mxu1 %v930_v11  ;;  %834 = vmatprep.subr.bf16.mxu0 %v931_v12  ;;  %v956_v39 = vld [vmem:[#allocation2 + $0x1c0] sm:$0xff]   ;;  %v959_v42 = vld [vmem:[#allocation2 + $0x148] sm:$0xff]   ;;  %v963_v46 = vld [vmem:[#allocation2 + $0x150] sm:$0xff]  }
  0x1f   :  { %856 = vmatprep.subr.bf16.mxu1 %v932_v13  ;;  %612 = vmatprep.mubr.bf16.mxu0 %v757_v35  ;;  %v957_v40 = vld [vmem:[#allocation2 + $0x100] sm:$0xff]   ;;  %v960_v43 = vld [vmem:[#allocation2 + $0x1c8] sm:$0xff]   ;;  %v964_v47 = vld [vmem:[#allocation2 + $0x1d0] sm:$0xff]  }
  0x20   :  { %652 = vmatprep.mubr.bf16.mxu1 %v759_v37  ;;  %v958_v41 = vld [vmem:[#allocation2 + $0x180] sm:$0xff]   ;;  %v961_v44 = vld [vmem:[#allocation2 + $0x108] sm:$0xff]   ;;  %v965_v48 = vld [vmem:[#allocation2 + $0x110] sm:$0xff]  }
  0x21   :  { %835 = vmatpush3.bf16.msra.mxu0 %v933_v14  ;;  %v962_v45 = vld [vmem:[#allocation2 + $0x188] sm:$0xff]   ;;  %v966_v49 = vld [vmem:[#allocation2 + $0x190] sm:$0xff]   ;;  %v967_v50 = vld [vmem:[#allocation2 + $0x158] sm:$0xff]  }
  0x22   :  { %857 = vmatpush3.bf16.msra.mxu1 %v934_v15  ;;  %836 = vmatprep.subr.bf16.mxu0 %v935_v16  ;;  %v968_v51 = vld [vmem:[#allocation2 + $0x1d8] sm:$0xff]   ;;  %v971_v54 = vld [vmem:[#allocation2 + $0x160] sm:$0xff]   ;;  %v975_v58 = vld [vmem:[#allocation2 + $0x168] sm:$0xff]  }
  0x23   :  { %858 = vmatprep.subr.bf16.mxu1 %v936_v17  ;;  %v969_v52 = vld [vmem:[#allocation2 + $0x118] sm:$0xff]   ;;  %v972_v55 = vld [vmem:[#allocation2 + $0x1e0] sm:$0xff]   ;;  %v976_v59 = vld [vmem:[#allocation2 + $0x1e8] sm:$0xff]  }
  0x24   :  { %v970_v53 = vld [vmem:[#allocation2 + $0x198] sm:$0xff]   ;;  %v973_v56 = vld [vmem:[#allocation2 + $0x120] sm:$0xff]   ;;  %v977_v60 = vld [vmem:[#allocation2 + $0x128] sm:$0xff]  }
  0x25   :  { %837 = vmatpush3.bf16.msra.mxu0 %v937_v18  ;;  %v974_v57 = vld [vmem:[#allocation2 + $0x1a0] sm:$0xff]   ;;  %v978_v61 = vld [vmem:[#allocation2 + $0x1a8] sm:$0xff]   ;;  %v979_v62 = vld [vmem:[#allocation2 + $0x170] sm:$0xff]  }
  0x26   :  { %859 = vmatpush3.bf16.msra.mxu1 %v938_v19  ;;  %838 = vmatprep.subr.bf16.mxu0 %v939_v20  ;;  %v980_v63 = vld [vmem:[#allocation2 + $0x1f0] sm:$0xff]   ;;  %v983_v2 = vld [vmem:[#allocation2 + $0x178] sm:$0xff]   ;;  %v755_v14 = vld [vmem:[%s1074_s2] ss:$0 sm:$0xff] }
  0x27   :  { %860 = vmatprep.subr.bf16.mxu1 %v940_v21  ;;  %v981_v0 = vld [vmem:[#allocation2 + $0x130] sm:$0xff]   ;;  %v984_v3 = vld [vmem:[#allocation2 + $0x1f8] sm:$0xff]  }
  0x28   :  { %v982_v1 = vld [vmem:[#allocation2 + $0x1b0] sm:$0xff]   ;;  %v985_v4 = vld [vmem:[#allocation2 + $0x138] sm:$0xff]  }
  0x29   :  { %839 = vmatpush3.bf16.msra.mxu0 %v941_v22  ;;  %v986_v5 = vld [vmem:[#allocation2 + $0x1b8] sm:$0xff]   ;;  %v31_v6 = vld [vmem:[%s1072_s0 + $0x10] sm:$0xff] }
  0x2a   :  { %861 = vmatpush3.bf16.msra.mxu1 %v942_v23  ;;  %840 = vmatprep.subr.bf16.mxu0 %v943_v24  ;;  %v760_v7 = vcombine.low %v31_v6, %v31_v6  ;;  %v761_v8 = vcombine.high %v31_v6, %v31_v6  ;;  %v32_v9 = vld [vmem:[%s1072_s0 + $0x18] sm:$0xff] }
  0x2b   :  { %862 = vmatprep.subr.bf16.mxu1 %v944_v25  ;;  %v762_v10 = vcombine.low %v32_v9, %v32_v9  ;;  %v763_v11 = vcombine.high %v32_v9, %v32_v9 }
  0x2d   :  { %841 = vmatpush3.bf16.msra.mxu0 %v945_v26 }
  0x2e   :  { %863 = vmatpush3.bf16.msra.mxu1 %v946_v27  ;;  %842 = vmatprep.subr.bf16.mxu0 %v947_v28 }
  0x2f   :  { %864 = vmatprep.subr.bf16.mxu1 %v948_v29 }
  0x31   :  { %843 = vmatpush3.bf16.msra.mxu0 %v949_v30 }
  0x32   :  { %865 = vmatpush3.bf16.msra.mxu1 %v950_v31  ;;  %872 = vmatprep.subr.bf16.mxu0 %v955_v38 }
  0x33   :  { %894 = vmatprep.subr.bf16.mxu1 %v956_v39 }
  0x34   :  { %613 = vmatmul.mubr.bf16.vlgmr.msra.gmra.mrb[0].mxu0 %v756_v34 }
  0x35   :  { %653 = vmatmul.mubr.bf16.vlgmr.msra.gmra.mrb[0].mxu1 %v758_v36  ;;  %873 = vmatpush3.bf16.msra.mxu0 %v957_v40 }
  0x36   :  { %895 = vmatpush3.bf16.msra.mxu1 %v958_v41  ;;  %874 = vmatprep.subr.bf16.mxu0 %v959_v42 }
  0x37   :  { %896 = vmatprep.subr.bf16.mxu1 %v960_v43  ;;  %692 = vmatprep.mubr.bf16.mxu0 %v761_v8 }
  0x38   :  { %732 = vmatprep.mubr.bf16.mxu1 %v763_v11 }
  0x39   :  { %875 = vmatpush3.bf16.msra.mxu0 %v961_v44 }
  0x3a   :  { %897 = vmatpush3.bf16.msra.mxu1 %v962_v45  ;;  %876 = vmatprep.subr.bf16.mxu0 %v963_v46 }
  0x3b   :  { %898 = vmatprep.subr.bf16.mxu1 %v964_v47 }
  0x3d   :  { %877 = vmatpush3.bf16.msra.mxu0 %v965_v48 }
  0x3e   :  { %899 = vmatpush3.bf16.msra.mxu1 %v966_v49  ;;  %878 = vmatprep.subr.bf16.mxu0 %v967_v50 }
  0x3f   :  { %900 = vmatprep.subr.bf16.mxu1 %v968_v51 }
  0x41   :  { %879 = vmatpush3.bf16.msra.mxu0 %v969_v52 }
  0x42   :  { %901 = vmatpush3.bf16.msra.mxu1 %v970_v53  ;;  %880 = vmatprep.subr.bf16.mxu0 %v971_v54 }
  0x43   :  { %902 = vmatprep.subr.bf16.mxu1 %v972_v55 }
  0x45   :  { %881 = vmatpush3.bf16.msra.mxu0 %v973_v56 }
  0x46   :  { %903 = vmatpush3.bf16.msra.mxu1 %v974_v57  ;;  %882 = vmatprep.subr.bf16.mxu0 %v975_v58 }
  0x47   :  { %904 = vmatprep.subr.bf16.mxu1 %v976_v59 }
  0x49   :  { %883 = vmatpush3.bf16.msra.mxu0 %v977_v60 }
  0x4a   :  { %905 = vmatpush3.bf16.msra.mxu1 %v978_v61  ;;  %884 = vmatprep.subr.bf16.mxu0 %v979_v62 }
  0x4b   :  { %906 = vmatprep.subr.bf16.mxu1 %v980_v63 }
  0x4d   :  { %885 = vmatpush3.bf16.msra.mxu0 %v981_v0 }
  0x4e   :  { %907 = vmatpush3.bf16.msra.mxu1 %v982_v1  ;;  %886 = vmatprep.subr.bf16.mxu0 %v983_v2 }
  0x4f   :  { %908 = vmatprep.subr.bf16.mxu1 %v984_v3 }
  0x51   :  { %887 = vmatpush3.bf16.msra.mxu0 %v985_v4 }
  0x52   :  { %909 = vmatpush3.bf16.msra.mxu1 %v986_v5 }
  0x54   :  { %693 = vmatmul.mubr.bf16.vlgmr.msra.gmra.mrb[4].mxu0 %v760_v7 }
  0x55   :  { %733 = vmatmul.mubr.bf16.vlgmr.msra.gmra.mrb[4].mxu1 %v762_v10 }
 0x107   :  { %v844_v12 = vpop.f32.mrb[0].mxu0 }
 0x108   :  { %v866_v13 = vpop.f32.mrb[0].mxu1  ;;  %v845_v15 = vpop.f32.mrb[1].mxu0 }
 0x109   :  { %v867_v16 = vpop.f32.mrb[1].mxu1  ;;  %v846_v17 = vadd.f32 %v845_v15, %v844_v12  ;;  %v847_v19 = vpop.f32.mrb[2].mxu0 }
 0x10a   :  { %v868_v18 = vadd.f32 %v867_v16, %v866_v13  ;;  %v869_v20 = vpop.f32.mrb[2].mxu1  ;;  %v848_v21 = vpop.f32.mrb[3].mxu0 }
 0x10b   :  { %v870_v22 = vpop.f32.mrb[3].mxu1  ;;  %v615_v23 = vadd.f32 %v846_v17, %v755_v14 }
 0x10d   :  { %v655_v24 = vadd.f32 %v868_v18, %v615_v23 }
 0x127   :  { %v888_v25 = vpop.f32.mrb[4].mxu0 }
 0x128   :  { %v910_v26 = vpop.f32.mrb[4].mxu1  ;;  %v889_v27 = vpop.f32.mrb[5].mxu0 }
 0x129   :  { %v911_v28 = vpop.f32.mrb[5].mxu1  ;;  %v890_v29 = vadd.f32 %v889_v27, %v888_v25  ;;  %v891_v31 = vpop.f32.mrb[6].mxu0 }
 0x12a   :  { %v912_v30 = vadd.f32 %v911_v28, %v910_v26  ;;  %v913_v32 = vpop.f32.mrb[6].mxu1  ;;  %v892_v33 = vpop.f32.mrb[7].mxu0 }
 0x12b   :  { %v914_v34 = vpop.f32.mrb[7].mxu1  ;;  %v695_v35 = vadd.f32 %v890_v29, %v655_v24 }
 0x12d   :  { %v735_v36 = vadd.f32 %v912_v30, %v695_v35 }
 0x12f   :  { %740 = vmax.xlane.f32.xlu0 %v735_v36 }
 0x1bc   :  { %v741_v37 = vpop.xlane.xlu0 %740 }
 0x1bd   :  { %v742_v38 = vsub.f32 %v735_v36, %v741_v37 }
 0x1bf   :  { %v743_v39 = vmul.f32 1.442695, %v742_v38 }
 0x1c1   :  { %991 = vpow2.f32 %v743_v39 }
 0x1cb   :  { %v992_v40 = vpop.eup %991 }
 0x1cc   :  { %745 = vadd.xlane.f32.xlu0 %v992_v40 }
 0x259   :  { %v746_v41 = vpop.xlane.xlu0 %745 }
 0x25a   :  { %993 = vrcp.f32 %v746_v41 }
 0x264   :  { %v994_v42 = vpop.eup %993 }
 0x265   :  { %v748_v43 = vmul.f32 %v994_v42, %v992_v40 }
 0x267   :  { %749 = vst [vmem:[%s1075_s3] sm:$0xff] %v748_v43 }
 0x268   :  { %754 = vsyncpa [#allocation3], 1 }

</bundles_post_ra>
